<compile_context>
chip_gen: v7x
topology: tpu7x:2x2x1
jax: 0.10.0
libtpu: 0.0.40
codegen_flags: <defaults>
</compile_context>

<pallas_src>
import jax
import jax.numpy as jnp
from jax.experimental import pallas as pl
from jax.experimental.pallas import tpu as pltpu

EPS = 1e-9
_STRIP_ROWS = 8                      # one sublane group per strip
_STRIP_MAX_COLS = 512                # strip is (8, <=512) f32 -> <=4 vregs/array
_BLOCK_BYTES_CAP = 4 * 1024 * 1024   # per-buffer output block cap (double-buffered)
_MAX_UNROLL = 32                     # static unroll limit for the point loop


# ----------------------------- Pallas kernel --------------------------------
def _make_tps_kernel(n):
    """Kernel computing a dense TPS map over one (2, TH, TW) output block.

    params_ref (SMEM, f32[4n+6]):
        [ px(n) | py(n) | wx(n) | wy(n) | A row-major (3x2 = 6) ]
    out_ref (VMEM, f32[2, TH, TW]): plane 0 = map_x, plane 1 = map_y.
    """

    def kernel(params_ref, out_ref):
        TH = out_ref.shape[1]
        TW = out_ref.shape[2]
        num_strips = TH // _STRIP_ROWS

        row_base = pl.program_id(0) * TH
        col_base = pl.program_id(1) * TW
        ab = 4 * n                                  # offset of flattened A (3x2)

        def point_contrib(j, gx, gy, ax, ay):
            dx = gx - params_ref[j]
            dy = gy - params_ref[n + j]
            d2 = dx * dx + dy * dy
            # keep +EPS: avoids 0 * log(0) = NaN when a pixel hits a point
            u = d2 * jnp.log(d2 + EPS)
            return ax + u * params_ref[2 * n + j], ay + u * params_ref[3 * n + j]

        # Row-strip loop bounds vector live ranges: every array below is a
        # (8, TW) strip (<= 4 vregs), so the full n-point chain fits in vregs.
        @pl.loop(0, num_strips)
        def _(s):
            r0 = pl.multiple_of(s * _STRIP_ROWS, _STRIP_ROWS)
            ry = jax.lax.broadcasted_iota(jnp.int32, (_STRIP_ROWS, TW), 0)
            rx = jax.lax.broadcasted_iota(jnp.int32, (_STRIP_ROWS, TW), 1)
            gy = (ry + (row_base + r0)).astype(jnp.float32)   # pixel y (row)
            gx = (rx + col_base).astype(jnp.float32)          # pixel x (col)

            # Affine part: [1, x, y] @ A   (A row-major at offset 4n).
            acc_x = params_ref[ab + 0] + gx * params_ref[ab + 2] + gy * params_ref[ab + 4]
            acc_y = params_ref[ab + 1] + gx * params_ref[ab + 3] + gy * params_ref[ab + 5]

            # Non-affine TPS part over the REAL control points only.
            if n <= _MAX_UNROLL:
                for j in range(n):                  # static unroll, SMEM scalar reads
                    acc_x, acc_y = point_contrib(j, gx, gy, acc_x, acc_y)
            else:
                # TODO(synk): for very large n (>~64) a (strip, n) U block fed to
                # jnp.dot on the MXU would offload ~40% of the VALU work; not
                # worth the n-padding at the sizes used here.
                def body(j, carry):
                    ax, ay = carry
                    return point_contrib(j, gx, gy, ax, ay)
                acc_x, acc_y = jax.lax.fori_loop(0, n, body, (acc_x, acc_y),
                                                 unroll=4)

            # Two lane-dense full-width stores per strip.
            out_ref[0, pl.ds(r0, _STRIP_ROWS), :] = acc_x
            out_ref[1, pl.ds(r0, _STRIP_ROWS), :] = acc_y

    return kernel


# ----------------------------- plain-JAX glue --------------------------------
def k_matrix(G, X):
    d2 = jnp.sum((G[:, None, :] - X[None, :, :]) ** 2, axis=-1)
    return d2 * jnp.log(d2 + EPS)


def calc_wa(X, Y):
    # TODO(synk): torch.inverse of the small (n+3)x(n+3) TPS system has no clean
    # Pallas equivalent; solved here with jnp.linalg.inv in plain JAX.
    n = X.shape[0]
    K = k_matrix(X, X)
    P = jnp.concatenate([jnp.ones((n, 1), jnp.float32), X], axis=1)
    L = jnp.zeros((n + 3, n + 3), jnp.float32)
    L = L.at[:n, :n].set(K)
    L = L.at[:n, n:].set(P)
    L = L.at[n:, :n].set(P.T)
    Z = jnp.zeros((n + 3, 2), jnp.float32).at[:n, :].set(Y)
    S = jnp.linalg.inv(L) @ Z
    return S[:n, :], S[n:, :]


def make_pixel_grid(h, w):
    # matches create_grid: grid[y, x] = [x, y]
    gx, gy = jnp.meshgrid(jnp.arange(w, dtype=jnp.float32),
                          jnp.arange(h, dtype=jnp.float32))
    return jnp.stack([gx, gy], axis=-1).reshape(h * w, 2)


def _round_up(x, m):
    return ((x + m - 1) // m) * m


def _largest_divisor(extent_units, cap_units, min_steps=1):
    """Largest divisor d of extent_units with d <= cap_units and
    extent_units // d >= min_steps; falls back to ignoring min_steps."""
    best_strict, best_loose = None, 1
    for d in range(1, extent_units + 1):
        if extent_units % d == 0 and d <= cap_units:
            best_loose = d
            if extent_units // d >= min_steps:
                best_strict = d
    return best_strict if best_strict is not None else best_loose


def _choose_tiles(h, w):
    # Lane axis: pad width to a multiple of 128; tile width <= 512 keeps each
    # row strip at <= 4 vregs per live array.
    w_pad = _round_up(w, 128)
    tw = 128 * _largest_divisor(w_pad // 128, _STRIP_MAX_COLS // 128)
    nw = w_pad // tw

    # Sublane axis: pick TH from divisors of round_up(h, 8) (no wasted padded
    # rows), under the per-buffer VMEM cap, keeping >= 2 total grid steps
    # whenever possible so both v7x TensorCores get work.
    h_pad = _round_up(h, _STRIP_ROWS)
    th_cap_units = max(_BLOCK_BYTES_CAP // (2 * 4 * tw * _STRIP_ROWS), 1)
    min_row_steps = 1 if nw >= 2 else 2
    th = _STRIP_ROWS * _largest_divisor(h_pad // _STRIP_ROWS, th_cap_units,
                                        min_steps=min_row_steps)
    return h_pad, w_pad, th, tw


def tps_forward_planes(h, w, p, q):
    """Dense TPS map as a lane-dense (2, h, w) f32 slab (plane 0 = x, 1 = y)."""
    n = int(p.shape[0])
    p = p.astype(jnp.float32)
    q = q.astype(jnp.float32)

    # small dense solve (glue)
    W, A = calc_wa(p, q)                              # (n, 2), (3, 2)

    # pack all scalar parameters into one small SMEM-resident vector
    params = jnp.concatenate(
        [p[:, 0], p[:, 1], W[:, 0], W[:, 1], A.reshape(-1)]).astype(jnp.float32)

    h_pad, w_pad, th, tw = _choose_tiles(h, w)

    cost = pl.CostEstimate(
        flops=int((11 * n + 8) * h_pad * w_pad),
        transcendentals=int(n * h_pad * w_pad),
        bytes_accessed=int(2 * 4 * h_pad * w_pad + 4 * params.size),
    )

    out = pl.pallas_call(
        _make_tps_kernel(n),
        out_shape=jax.ShapeDtypeStruct((2, h_pad, w_pad), jnp.float32),
        grid=(h_pad // th, w_pad // tw),
        in_specs=[pl.BlockSpec(memory_space=pltpu.MemorySpace.SMEM)],
        out_specs=pl.BlockSpec((2, th, tw), lambda i, j: (0, i, j)),
        compiler_params=pltpu.CompilerParams(
            dimension_semantics=("parallel", "parallel")),
        cost_estimate=cost,
    )(params)

    return out[:, :h, :w]


def tps_forward(img, p, q):
    """Pallas equivalent of TPS_Module.forward(img, p, q) -> (h, w, 2)."""
    h, w = img.shape[0], img.shape[1]
    planes = tps_forward_planes(h, w, p, q)
    # NOTE: the (h, w, 2) layout is mandated by the torch module; consumers
    # that can take per-plane maps (e.g. remap) should call tps_forward_planes
    # directly and skip this lane-hostile final transpose.
    return jnp.moveaxis(planes, 0, -1)


def tps_forward_reference(img, p, q):
    """Pure-JAX reference mirroring the PyTorch module exactly."""
    h, w = img.shape[0], img.shape[1]
    grid = make_pixel_grid(h, w)                      # (hw, 2)
    p = p.astype(jnp.float32)
    q = q.astype(jnp.float32)
    U = k_matrix(grid, p)                             # (hw, n)
    P = jnp.concatenate([jnp.ones((h * w, 1), jnp.float32), grid], axis=1)
    W, A = calc_wa(p, q)
    mapxy = (jnp.dot(P, A, precision=jax.lax.Precision.HIGHEST)
             + jnp.dot(U, W, precision=jax.lax.Precision.HIGHEST))
    return mapxy.reshape(h, w, 2)


def _check(mapxy, ref, name):
    err = jnp.abs(mapxy - ref)
    tol = 1e-2 + 1e-4 * jnp.abs(ref)
    assert bool(jnp.all(err <= tol)), (
        f"{name}: mismatch vs reference, max_err={float(jnp.max(err))}")


# --------------------------------- demo --------------------------------------
if __name__ == "__main__":
    keys = jax.random.split(jax.random.PRNGKey(0), 6)

    # ---- test 1: small image, 8 control points ----
    h, w, c = 16, 16, 3
    n = 8
    img = jax.random.normal(keys[0], (h, w, c), dtype=jnp.float32)
    p = jax.random.uniform(keys[1], (n, 2), dtype=jnp.float32,
                           minval=0.0, maxval=float(min(h, w) - 1))
    q = p + 2.0 * jax.random.normal(keys[2], (n, 2), dtype=jnp.float32)

    mapxy = jax.block_until_ready(tps_forward(img, p, q))
    assert mapxy.shape == (h, w, 2)
    assert mapxy.dtype == jnp.float32
    _check(mapxy, tps_forward_reference(img, p, q), "test1")

    # ---- test 2: non-aligned sizes, multi-step grid, 11 control points ----
    h2, w2, c2 = 300, 257, 3
    n2 = 11
    img2 = jax.random.normal(keys[3], (h2, w2, c2), dtype=jnp.float32)
    p2 = jax.random.uniform(keys[4], (n2, 2), dtype=jnp.float32,
                            minval=0.0, maxval=float(min(h2, w2) - 1))
    q2 = p2 + 3.0 * jax.random.normal(keys[5], (n2, 2), dtype=jnp.float32)

    mapxy2 = jax.block_until_ready(tps_forward(img2, p2, q2))
    assert mapxy2.shape == (h2, w2, 2)
    _check(mapxy2, tps_forward_reference(img2, p2, q2), "test2")

    print("KERNEL_OK")
</pallas_src>

<mosaic_0001>
module attributes {stable_mosaic.version = 11 : i64} {
  func.func @kernel(%arg0: i32, %arg1: i32, %arg2: memref<38xf32, #tpu.memory_space<smem>>, %arg3: memref<2x8x128xf32, #tpu.memory_space<vmem>>) attributes {dimension_semantics = [#tpu.dimension_semantics<parallel>, #tpu.dimension_semantics<parallel>], iteration_bounds = array<i64: 2, 1>, scalar_prefetch = 0 : i64, scratch_operands = 0 : i64, tpu.core_type = #tpu.core_type<tc>, window_params = [{transform_indices = @transform_0, window_bounds = array<i64: 38>}, {transform_indices = @transform_1, window_bounds = array<i64: 2, 8, 128>}]} {
    %c8_i32 = arith.constant 8 : i32
    %0 = arith.muli %arg0, %c8_i32 : i32
    %c128_i32 = arith.constant 128 : i32
    %1 = arith.muli %arg1, %c128_i32 : i32
    %c0_i32 = arith.constant 0 : i32
    %c1_i32 = arith.constant 1 : i32
    %2 = arith.muli %c0_i32, %c1_i32 : i32
    %c0_i32_0 = arith.constant 0 : i32
    %3 = arith.addi %c0_i32_0, %2 : i32
    %c8_i32_1 = arith.constant 8 : i32
    %4 = arith.muli %3, %c8_i32_1 : i32
    %5 = tpu.assume_multiple %4, 8 : i32
    %6 = tpu.iota {dimensions = array<i32: 0>} : vector<8x128xi32>
    %7 = tpu.iota {dimensions = array<i32: 1>} : vector<8x128xi32>
    %8 = arith.addi %0, %5 : i32
    %9 = vector.broadcast %8 : i32 to vector<8x128xi32>
    %10 = arith.addi %6, %9 : vector<8x128xi32>
    %11 = arith.sitofp %10 : vector<8x128xi32> to vector<8x128xf32>
    %12 = vector.broadcast %1 : i32 to vector<8x128xi32>
    %13 = arith.addi %7, %12 : vector<8x128xi32>
    %14 = arith.sitofp %13 : vector<8x128xi32> to vector<8x128xf32>
    %c32 = arith.constant 32 : index
    %15 = memref.load %arg2[%c32] : memref<38xf32, #tpu.memory_space<smem>>
    %c34 = arith.constant 34 : index
    %16 = memref.load %arg2[%c34] : memref<38xf32, #tpu.memory_space<smem>>
    %17 = vector.broadcast %16 : f32 to vector<8x128xf32>
    %18 = arith.mulf %14, %17 : vector<8x128xf32>
    %19 = vector.broadcast %15 : f32 to vector<8x128xf32>
    %20 = arith.addf %19, %18 : vector<8x128xf32>
    %c36 = arith.constant 36 : index
    %21 = memref.load %arg2[%c36] : memref<38xf32, #tpu.memory_space<smem>>
    %22 = vector.broadcast %21 : f32 to vector<8x128xf32>
    %23 = arith.mulf %11, %22 : vector<8x128xf32>
    %24 = arith.addf %20, %23 : vector<8x128xf32>
    %c33 = arith.constant 33 : index
    %25 = memref.load %arg2[%c33] : memref<38xf32, #tpu.memory_space<smem>>
    %c35 = arith.constant 35 : index
    %26 = memref.load %arg2[%c35] : memref<38xf32, #tpu.memory_space<smem>>
    %27 = vector.broadcast %26 : f32 to vector<8x128xf32>
    %28 = arith.mulf %14, %27 : vector<8x128xf32>
    %29 = vector.broadcast %25 : f32 to vector<8x128xf32>
    %30 = arith.addf %29, %28 : vector<8x128xf32>
    %c37 = arith.constant 37 : index
    %31 = memref.load %arg2[%c37] : memref<38xf32, #tpu.memory_space<smem>>
    %32 = vector.broadcast %31 : f32 to vector<8x128xf32>
    %33 = arith.mulf %11, %32 : vector<8x128xf32>
    %34 = arith.addf %30, %33 : vector<8x128xf32>
    %c0 = arith.constant 0 : index
    %35 = memref.load %arg2[%c0] : memref<38xf32, #tpu.memory_space<smem>>
    %36 = vector.broadcast %35 : f32 to vector<8x128xf32>
    %37 = arith.subf %14, %36 : vector<8x128xf32>
    %c8 = arith.constant 8 : index
    %38 = memref.load %arg2[%c8] : memref<38xf32, #tpu.memory_space<smem>>
    %39 = vector.broadcast %38 : f32 to vector<8x128xf32>
    %40 = arith.subf %11, %39 : vector<8x128xf32>
    %41 = arith.mulf %37, %37 : vector<8x128xf32>
    %42 = arith.mulf %40, %40 : vector<8x128xf32>
    %43 = arith.addf %41, %42 : vector<8x128xf32>
    %cst = arith.constant 9.99999971E-10 : f32
    %44 = vector.broadcast %cst : f32 to vector<8x128xf32>
    %45 = arith.addf %43, %44 : vector<8x128xf32>
    %46 = math.log %45 : vector<8x128xf32>
    %47 = arith.mulf %43, %46 : vector<8x128xf32>
    %c16 = arith.constant 16 : index
    %48 = memref.load %arg2[%c16] : memref<38xf32, #tpu.memory_space<smem>>
    %49 = vector.broadcast %48 : f32 to vector<8x128xf32>
    %50 = arith.mulf %47, %49 : vector<8x128xf32>
    %51 = arith.addf %24, %50 : vector<8x128xf32>
    %c24 = arith.constant 24 : index
    %52 = memref.load %arg2[%c24] : memref<38xf32, #tpu.memory_space<smem>>
    %53 = vector.broadcast %52 : f32 to vector<8x128xf32>
    %54 = arith.mulf %47, %53 : vector<8x128xf32>
    %55 = arith.addf %34, %54 : vector<8x128xf32>
    %c1 = arith.constant 1 : index
    %56 = memref.load %arg2[%c1] : memref<38xf32, #tpu.memory_space<smem>>
    %57 = vector.broadcast %56 : f32 to vector<8x128xf32>
    %58 = arith.subf %14, %57 : vector<8x128xf32>
    %c9 = arith.constant 9 : index
    %59 = memref.load %arg2[%c9] : memref<38xf32, #tpu.memory_space<smem>>
    %60 = vector.broadcast %59 : f32 to vector<8x128xf32>
    %61 = arith.subf %11, %60 : vector<8x128xf32>
    %62 = arith.mulf %58, %58 : vector<8x128xf32>
    %63 = arith.mulf %61, %61 : vector<8x128xf32>
    %64 = arith.addf %62, %63 : vector<8x128xf32>
    %cst_2 = arith.constant 9.99999971E-10 : f32
    %65 = vector.broadcast %cst_2 : f32 to vector<8x128xf32>
    %66 = arith.addf %64, %65 : vector<8x128xf32>
    %67 = math.log %66 : vector<8x128xf32>
    %68 = arith.mulf %64, %67 : vector<8x128xf32>
    %c17 = arith.constant 17 : index
    %69 = memref.load %arg2[%c17] : memref<38xf32, #tpu.memory_space<smem>>
    %70 = vector.broadcast %69 : f32 to vector<8x128xf32>
    %71 = arith.mulf %68, %70 : vector<8x128xf32>
    %72 = arith.addf %51, %71 : vector<8x128xf32>
    %c25 = arith.constant 25 : index
    %73 = memref.load %arg2[%c25] : memref<38xf32, #tpu.memory_space<smem>>
    %74 = vector.broadcast %73 : f32 to vector<8x128xf32>
    %75 = arith.mulf %68, %74 : vector<8x128xf32>
    %76 = arith.addf %55, %75 : vector<8x128xf32>
    %c2 = arith.constant 2 : index
    %77 = memref.load %arg2[%c2] : memref<38xf32, #tpu.memory_space<smem>>
    %78 = vector.broadcast %77 : f32 to vector<8x128xf32>
    %79 = arith.subf %14, %78 : vector<8x128xf32>
    %c10 = arith.constant 10 : index
    %80 = memref.load %arg2[%c10] : memref<38xf32, #tpu.memory_space<smem>>
    %81 = vector.broadcast %80 : f32 to vector<8x128xf32>
    %82 = arith.subf %11, %81 : vector<8x128xf32>
    %83 = arith.mulf %79, %79 : vector<8x128xf32>
    %84 = arith.mulf %82, %82 : vector<8x128xf32>
    %85 = arith.addf %83, %84 : vector<8x128xf32>
    %cst_3 = arith.constant 9.99999971E-10 : f32
    %86 = vector.broadcast %cst_3 : f32 to vector<8x128xf32>
    %87 = arith.addf %85, %86 : vector<8x128xf32>
    %88 = math.log %87 : vector<8x128xf32>
    %89 = arith.mulf %85, %88 : vector<8x128xf32>
    %c18 = arith.constant 18 : index
    %90 = memref.load %arg2[%c18] : memref<38xf32, #tpu.memory_space<smem>>
    %91 = vector.broadcast %90 : f32 to vector<8x128xf32>
    %92 = arith.mulf %89, %91 : vector<8x128xf32>
    %93 = arith.addf %72, %92 : vector<8x128xf32>
    %c26 = arith.constant 26 : index
    %94 = memref.load %arg2[%c26] : memref<38xf32, #tpu.memory_space<smem>>
    %95 = vector.broadcast %94 : f32 to vector<8x128xf32>
    %96 = arith.mulf %89, %95 : vector<8x128xf32>
    %97 = arith.addf %76, %96 : vector<8x128xf32>
    %c3 = arith.constant 3 : index
    %98 = memref.load %arg2[%c3] : memref<38xf32, #tpu.memory_space<smem>>
    %99 = vector.broadcast %98 : f32 to vector<8x128xf32>
    %100 = arith.subf %14, %99 : vector<8x128xf32>
    %c11 = arith.constant 11 : index
    %101 = memref.load %arg2[%c11] : memref<38xf32, #tpu.memory_space<smem>>
    %102 = vector.broadcast %101 : f32 to vector<8x128xf32>
    %103 = arith.subf %11, %102 : vector<8x128xf32>
    %104 = arith.mulf %100, %100 : vector<8x128xf32>
    %105 = arith.mulf %103, %103 : vector<8x128xf32>
    %106 = arith.addf %104, %105 : vector<8x128xf32>
    %cst_4 = arith.constant 9.99999971E-10 : f32
    %107 = vector.broadcast %cst_4 : f32 to vector<8x128xf32>
    %108 = arith.addf %106, %107 : vector<8x128xf32>
    %109 = math.log %108 : vector<8x128xf32>
    %110 = arith.mulf %106, %109 : vector<8x128xf32>
    %c19 = arith.constant 19 : index
    %111 = memref.load %arg2[%c19] : memref<38xf32, #tpu.memory_space<smem>>
    %112 = vector.broadcast %111 : f32 to vector<8x128xf32>
    %113 = arith.mulf %110, %112 : vector<8x128xf32>
    %114 = arith.addf %93, %113 : vector<8x128xf32>
    %c27 = arith.constant 27 : index
    %115 = memref.load %arg2[%c27] : memref<38xf32, #tpu.memory_space<smem>>
    %116 = vector.broadcast %115 : f32 to vector<8x128xf32>
    %117 = arith.mulf %110, %116 : vector<8x128xf32>
    %118 = arith.addf %97, %117 : vector<8x128xf32>
    %c4 = arith.constant 4 : index
    %119 = memref.load %arg2[%c4] : memref<38xf32, #tpu.memory_space<smem>>
    %120 = vector.broadcast %119 : f32 to vector<8x128xf32>
    %121 = arith.subf %14, %120 : vector<8x128xf32>
    %c12 = arith.constant 12 : index
    %122 = memref.load %arg2[%c12] : memref<38xf32, #tpu.memory_space<smem>>
    %123 = vector.broadcast %122 : f32 to vector<8x128xf32>
    %124 = arith.subf %11, %123 : vector<8x128xf32>
    %125 = arith.mulf %121, %121 : vector<8x128xf32>
    %126 = arith.mulf %124, %124 : vector<8x128xf32>
    %127 = arith.addf %125, %126 : vector<8x128xf32>
    %cst_5 = arith.constant 9.99999971E-10 : f32
    %128 = vector.broadcast %cst_5 : f32 to vector<8x128xf32>
    %129 = arith.addf %127, %128 : vector<8x128xf32>
    %130 = math.log %129 : vector<8x128xf32>
    %131 = arith.mulf %127, %130 : vector<8x128xf32>
    %c20 = arith.constant 20 : index
    %132 = memref.load %arg2[%c20] : memref<38xf32, #tpu.memory_space<smem>>
    %133 = vector.broadcast %132 : f32 to vector<8x128xf32>
    %134 = arith.mulf %131, %133 : vector<8x128xf32>
    %135 = arith.addf %114, %134 : vector<8x128xf32>
    %c28 = arith.constant 28 : index
    %136 = memref.load %arg2[%c28] : memref<38xf32, #tpu.memory_space<smem>>
    %137 = vector.broadcast %136 : f32 to vector<8x128xf32>
    %138 = arith.mulf %131, %137 : vector<8x128xf32>
    %139 = arith.addf %118, %138 : vector<8x128xf32>
    %c5 = arith.constant 5 : index
    %140 = memref.load %arg2[%c5] : memref<38xf32, #tpu.memory_space<smem>>
    %141 = vector.broadcast %140 : f32 to vector<8x128xf32>
    %142 = arith.subf %14, %141 : vector<8x128xf32>
    %c13 = arith.constant 13 : index
    %143 = memref.load %arg2[%c13] : memref<38xf32, #tpu.memory_space<smem>>
    %144 = vector.broadcast %143 : f32 to vector<8x128xf32>
    %145 = arith.subf %11, %144 : vector<8x128xf32>
    %146 = arith.mulf %142, %142 : vector<8x128xf32>
    %147 = arith.mulf %145, %145 : vector<8x128xf32>
    %148 = arith.addf %146, %147 : vector<8x128xf32>
    %cst_6 = arith.constant 9.99999971E-10 : f32
    %149 = vector.broadcast %cst_6 : f32 to vector<8x128xf32>
    %150 = arith.addf %148, %149 : vector<8x128xf32>
    %151 = math.log %150 : vector<8x128xf32>
    %152 = arith.mulf %148, %151 : vector<8x128xf32>
    %c21 = arith.constant 21 : index
    %153 = memref.load %arg2[%c21] : memref<38xf32, #tpu.memory_space<smem>>
    %154 = vector.broadcast %153 : f32 to vector<8x128xf32>
    %155 = arith.mulf %152, %154 : vector<8x128xf32>
    %156 = arith.addf %135, %155 : vector<8x128xf32>
    %c29 = arith.constant 29 : index
    %157 = memref.load %arg2[%c29] : memref<38xf32, #tpu.memory_space<smem>>
    %158 = vector.broadcast %157 : f32 to vector<8x128xf32>
    %159 = arith.mulf %152, %158 : vector<8x128xf32>
    %160 = arith.addf %139, %159 : vector<8x128xf32>
    %c6 = arith.constant 6 : index
    %161 = memref.load %arg2[%c6] : memref<38xf32, #tpu.memory_space<smem>>
    %162 = vector.broadcast %161 : f32 to vector<8x128xf32>
    %163 = arith.subf %14, %162 : vector<8x128xf32>
    %c14 = arith.constant 14 : index
    %164 = memref.load %arg2[%c14] : memref<38xf32, #tpu.memory_space<smem>>
    %165 = vector.broadcast %164 : f32 to vector<8x128xf32>
    %166 = arith.subf %11, %165 : vector<8x128xf32>
    %167 = arith.mulf %163, %163 : vector<8x128xf32>
    %168 = arith.mulf %166, %166 : vector<8x128xf32>
    %169 = arith.addf %167, %168 : vector<8x128xf32>
    %cst_7 = arith.constant 9.99999971E-10 : f32
    %170 = vector.broadcast %cst_7 : f32 to vector<8x128xf32>
    %171 = arith.addf %169, %170 : vector<8x128xf32>
    %172 = math.log %171 : vector<8x128xf32>
    %173 = arith.mulf %169, %172 : vector<8x128xf32>
    %c22 = arith.constant 22 : index
    %174 = memref.load %arg2[%c22] : memref<38xf32, #tpu.memory_space<smem>>
    %175 = vector.broadcast %174 : f32 to vector<8x128xf32>
    %176 = arith.mulf %173, %175 : vector<8x128xf32>
    %177 = arith.addf %156, %176 : vector<8x128xf32>
    %c30 = arith.constant 30 : index
    %178 = memref.load %arg2[%c30] : memref<38xf32, #tpu.memory_space<smem>>
    %179 = vector.broadcast %178 : f32 to vector<8x128xf32>
    %180 = arith.mulf %173, %179 : vector<8x128xf32>
    %181 = arith.addf %160, %180 : vector<8x128xf32>
    %c7 = arith.constant 7 : index
    %182 = memref.load %arg2[%c7] : memref<38xf32, #tpu.memory_space<smem>>
    %183 = vector.broadcast %182 : f32 to vector<8x128xf32>
    %184 = arith.subf %14, %183 : vector<8x128xf32>
    %c15 = arith.constant 15 : index
    %185 = memref.load %arg2[%c15] : memref<38xf32, #tpu.memory_space<smem>>
    %186 = vector.broadcast %185 : f32 to vector<8x128xf32>
    %187 = arith.subf %11, %186 : vector<8x128xf32>
    %188 = arith.mulf %184, %184 : vector<8x128xf32>
    %189 = arith.mulf %187, %187 : vector<8x128xf32>
    %190 = arith.addf %188, %189 : vector<8x128xf32>
    %cst_8 = arith.constant 9.99999971E-10 : f32
    %191 = vector.broadcast %cst_8 : f32 to vector<8x128xf32>
    %192 = arith.addf %190, %191 : vector<8x128xf32>
    %193 = math.log %192 : vector<8x128xf32>
    %194 = arith.mulf %190, %193 : vector<8x128xf32>
    %c23 = arith.constant 23 : index
    %195 = memref.load %arg2[%c23] : memref<38xf32, #tpu.memory_space<smem>>
    %196 = vector.broadcast %195 : f32 to vector<8x128xf32>
    %197 = arith.mulf %194, %196 : vector<8x128xf32>
    %198 = arith.addf %177, %197 : vector<8x128xf32>
    %c31 = arith.constant 31 : index
    %199 = memref.load %arg2[%c31] : memref<38xf32, #tpu.memory_space<smem>>
    %200 = vector.broadcast %199 : f32 to vector<8x128xf32>
    %201 = arith.mulf %194, %200 : vector<8x128xf32>
    %202 = arith.addf %181, %201 : vector<8x128xf32>
    %c0_9 = arith.constant 0 : index
    %203 = arith.index_cast %5 : i32 to index
    %c0_10 = arith.constant 0 : index
    %204 = vector.load %arg3[%c0_9, %203, %c0_10] : memref<2x8x128xf32, #tpu.memory_space<vmem>>, vector<1x8x128xf32>
    %205 = vector.shape_cast %204 : vector<1x8x128xf32> to vector<8x128xf32>
    %206 = vector.shape_cast %198 : vector<8x128xf32> to vector<1x8x128xf32>
    tpu.vector_store %arg3[%c0_9, %203, %c0_10], %206 {strides = array<i32>} : memref<2x8x128xf32, #tpu.memory_space<vmem>>, vector<1x8x128xf32>,
    %c1_11 = arith.constant 1 : index
    %207 = arith.index_cast %5 : i32 to index
    %c0_12 = arith.constant 0 : index
    %208 = vector.load %arg3[%c1_11, %207, %c0_12] : memref<2x8x128xf32, #tpu.memory_space<vmem>>, vector<1x8x128xf32>
    %209 = vector.shape_cast %208 : vector<1x8x128xf32> to vector<8x128xf32>
    %210 = vector.shape_cast %202 : vector<8x128xf32> to vector<1x8x128xf32>
    tpu.vector_store %arg3[%c1_11, %207, %c0_12], %210 {strides = array<i32>} : memref<2x8x128xf32, #tpu.memory_space<vmem>>, vector<1x8x128xf32>,
    %c1_i32_13 = arith.constant 1 : i32
    return
  }
  func.func @transform_0(%arg0: i32, %arg1: i32) -> i32 {
    %c0_i32 = arith.constant 0 : i32
    %c0_i32_0 = arith.constant 0 : i32
    return %c0_i32 : i32
  }
  func.func @transform_1(%arg0: i32, %arg1: i32) -> (i32, i32, i32) {
    %c0_i32 = arith.constant 0 : i32
    %c0_i32_0 = arith.constant 0 : i32
    return %c0_i32, %arg0, %arg1 : i32, i32, i32
  }
}

</mosaic_0001>

<bundles_post_ra>
// kernel: tpu_custom_call.1
= control target key start
LH: loop header
LB: loop body
LE: loop exit
PB: predicated region body
PF: predicated region fallthrough
CT: control target
= control target key end

     0   :  { %6 = vsyncpa [#allocation4], 0  ;;  %s946_s0 = inlined_call_operand.hbm [shape: f32[38], index: 0, kind: input, shape index: {}]   ;;  %s947_s1 = inlined_call_operand.hbm [shape: f32[2,16,128], index: 1, kind: output, shape index: {}]  }
   0x1   :  { %7 = vsyncpa [#allocation3], 0 }
   0x2   :  { %9 = vsyncpa [#allocation3 + $0x1], 0  ;;  %s659_s6 = smov 0   ;;  %s661_s7 = smov 0  }
   0x3   :  { %s663_s8 = smov 0   ;;  %s665_s9 = smov 0  }
   0x4   :  { %s667_s10 = smov 0   ;;  %s669_s11 = smov 0  }
   0x5 LB: > { %s412_s12 = sadd.s32 4294967295, %s642_s11   ;;  %s413_s13 = sadd.s32 4294967294, %s642_s11   ;;  %s642_s11 = sphi %s669_s11, %s15_s11   ;;  %s638_s10 = sphi %s667_s10, %s956_s10   ;;  %s634_s9 = sphi %s665_s9, %s955_s9   ;;  %s630_s8 = sphi %s663_s8, %s954_s8   ;;  %s626_s7 = sphi %s661_s7, %s953_s7   ;;  %s622_s6 = sphi %s659_s6, %s952_s6  }
   0x6   : > { %s27_s14 = sadd.s32 1, %s638_s10  ;;  %s57_s15 = sadd.s32 1, %s630_s8 }
   0x7   : > { %p29_p0 = scmp.ge.s32.totalorder %s27_s14, 2  ;;  %p67_p1 = scmp.ne.s32.totalorder %s630_s8, %s626_s7 }
   0x8   : > { %p68_p2 = scmp.eq.s32.totalorder %s412_s12, 1  ;;  %p73_p3 = scmp.ne.s32.totalorder %s626_s7, %s622_s6 }
   0x9   : > { %s958_s14 = smov (%p29_p0, %s27_s14), 0  ;;  %p74_p5 = scmp.eq.s32.totalorder %s413_s13, 1 }
   0xa   : > { %p699_p4 = por %p68_p2, %p67_p1  ;;  %s52_s17 = ssub.s32 %s638_s10, %s958_s14 }
   0xb   : > { %p414_p6 = scmp.ge.s32.totalorder %s642_s11, 1  ;;  %p55_p7 = scmp.eq.s32.totalorder %s52_s17, 0 }
   0xc   : > { %p706_p8 = por %p74_p5, %p73_p3  ;;  %p81_p9 = scmp.lt.s32.totalorder %s642_s11, 3 }
   0xd   : > { %s712_s19 = scalar_select %p55_p7, %s630_s8, %s57_s15  }
   0xe   : > { %p714_p10 = pnand %p414_p6, %p81_p9  ;;  %p718_p11 = scmp.eq.s32.totalorder %s412_s12, 0 }
   0xf   : > { %s547_s24 = scalar_lea.hbm %s946_s0, 16 }
  0x10   : > { %p468_p12 = pneg %p714_p10  ;;  %p548_p0 = scmp.ne.s32.totalorder %s946_s0, %s547_s24 }
  0x11   : > { %p554_p5 = scmp.lt.u32.totalorder %s547_s24, %s946_s0 }
  0x12   : > { %p469_p13 = pnand %p718_p11, %p468_p12 }
  0x14   : > { %p549_p1 = pneg %p469_p13 }
  0x16   : > { %p550_p2 = pnand %p549_p1, %p548_p0 }
  0x18   : > { %p551_p3 = pneg %p550_p2 }
  0x1a   : > { %p556_p6 = pnand %p554_p5, %p551_p3 }
  0x1c   : > { %559 = shalt.err (!%p556_p6)
}
  0x1d   : > { %s644_s29 = smov [#allocation2]   ;;  %105 = sbr.rel (%p714_p10) target bundleno = 108 (0x6c), region = 24 }
  0x1e   : > { %471 = dma.hbm_to_smem (!%p469_p13), %s946_s0, 16, %s644_s29, [#allocation4]  }
  0x24   : > { %613 = dma.done.wait (%p718_p11), [#allocation4], 16  }
  0x25   : > { %615 = vsyncadd (%p718_p11), [#allocation4], 4294967280 }
  0x26   : > { %111 = sfence }
  0x27   : > { %s419_s3 = sshll.u32 %s634_s9, 3  ;;  %v123_v0 = vlaneseq  ;;  %s154_s4 = sld [smem:[#allocation2]] }
  0x28   : > { %v128_v2 = vstv %s419_s3  ;;  %s426_s5 = sld [smem:[#allocation2 + $0x8]]  ;;  %s745_s12 = sld [smem:[#allocation2 + $0x22]] }
  0x29   : > { %v124_v1 = vshrl.u32 %v123_v0, 7  ;;  %v126_v3 = vand.u32 127, %v123_v0  ;;  %s429_s13 = sld [smem:[#allocation2 + $0x1]]  ;;  %s433_s17 = sld [smem:[#allocation2 + $0x2]] }
  0x2a   : > { %s430_s15 = sld [smem:[#allocation2 + $0x9]]  ;;  %s434_s20 = sld [smem:[#allocation2 + $0xa]] }
  0x2b   : > { %v129_v4 = vadd.s32 %v128_v2, %v124_v1  ;;  %v747_v5 = vcvt.s32.f32 %v126_v3  ;;  %s751_s21 = sld [smem:[#allocation2 + $0x20]]  ;;  %s753_s22 = sld [smem:[#allocation2 + $0x3]] }
  0x2c   : > { %s755_s23 = sld [smem:[#allocation2 + $0xb]]  ;;  %s757_s24 = sld [smem:[#allocation2 + $0x24]] }
  0x2d   : > { %v749_v6 = vcvt.s32.f32 %v129_v4  ;;  %v155_v7 = vstv %s154_s4  ;;  %s761_s25 = sld [smem:[#allocation2 + $0x4]]  ;;  %s763_s26 = sld [smem:[#allocation2 + $0x23]] }
  0x2e   : > { %v156_v8 = vsub.f32 %v747_v5, %v155_v7  ;;  %v158_v9 = vstv %s426_s5  ;;  %s766_s27 = sld [smem:[#allocation2 + $0xc]]  ;;  %v136_v15 = vstv %s745_s12  ;;  %s769_s28 = sld [smem:[#allocation2 + $0x21]] }
  0x2f   : > { %v159_v10 = vsub.f32 %v749_v6, %v158_v9  ;;  %v176_v11 = vstv %s429_s13  ;;  %v197_v19 = vstv %s433_s17  ;;  %s772_s29 = sld [smem:[#allocation2 + $0x5]]  ;;  %v137_v25 = vmul.f32 %v136_v15, %v747_v5  ;;  %s786_s3 = sld [smem:[#allocation2 + $0x6]] }
  0x30   : > { %v160_v12 = vmul.f32 %v156_v8, %v156_v8  ;;  %v177_v13 = vsub.f32 %v747_v5, %v176_v11  ;;  %v179_v14 = vstv %s430_s15  ;;  %v200_v20 = vstv %s434_s20  ;;  %s774_s30 = sld [smem:[#allocation2 + $0xd]]  ;;  %s795_s4 = sld [smem:[#allocation2 + $0xe]] }
  0x31   : > { %v161_v16 = vmul.f32 %v159_v10, %v159_v10  ;;  %v180_v17 = vsub.f32 %v749_v6, %v179_v14  ;;  %v198_v23 = vsub.f32 %v747_v5, %v197_v19  ;;  %v201_v24 = vsub.f32 %v749_v6, %v200_v20  ;;  %s782_s2 = sld [smem:[#allocation2 + $0x25]]  ;;  %s803_s5 = sld [smem:[#allocation2 + $0x7]] }
  0x32   : > { %v181_v18 = vmul.f32 %v177_v13, %v177_v13  ;;  %v138_v26 = vstv %s751_s21  ;;  %v218_v27 = vstv %s753_s22  ;;  %v221_v28 = vstv %s755_s23  ;;  %s805_s12 = sld [smem:[#allocation2 + $0xf]]  ;;  %s810_s13 = sld [smem:[#allocation2 + $0x10]] }
  0x33   : > { %v776_v21 = vadd.f32 %v161_v16, %v160_v12  ;;  %v182_v22 = vmul.f32 %v180_v17, %v180_v17  ;;  %v202_v31 = vmul.f32 %v198_v23, %v198_v23  ;;  %v203_v32 = vmul.f32 %v201_v24, %v201_v24  ;;  %s812_s15 = sld [smem:[#allocation2 + $0x18]]  ;;  %s824_s17 = sld [smem:[#allocation2 + $0x11]] }
  0x34   : > { %v141_v33 = vstv %s757_s24  ;;  %v219_v34 = vsub.f32 %v747_v5, %v218_v27  ;;  %v222_v35 = vsub.f32 %v749_v6, %v221_v28  ;;  %v239_v36 = vstv %s761_s25  ;;  %s826_s20 = sld [smem:[#allocation2 + $0x19]]  ;;  %s833_s21 = sld [smem:[#allocation2 + $0x12]] }
  0x35   : > { %v163_v29 = vadd.f32 1e-09, %v776_v21  ;;  %v789_v30 = vadd.f32 %v182_v22, %v181_v18  ;;  %v798_v38 = vadd.f32 %v203_v32, %v202_v31  ;;  %v240_v39 = vsub.f32 %v747_v5, %v239_v36  ;;  %s835_s22 = sld [smem:[#allocation2 + $0x1a]]  ;;  %s848_s23 = sld [smem:[#allocation2 + $0x13]] }
  0x36   : > { %v146_v40 = vstv %s763_s26  ;;  %v223_v41 = vmul.f32 %v219_v34, %v219_v34  ;;  %v224_v42 = vmul.f32 %v222_v35, %v222_v35  ;;  %v242_v43 = vstv %s766_s27  ;;  %s850_s24 = sld [smem:[#allocation2 + $0x1b]]  ;;  %s856_s25 = sld [smem:[#allocation2 + $0x14]] }
  0x37   : > { %531 = vlog2.f32 %v163_v29  ;;  %v184_v37 = vadd.f32 1e-09, %v789_v30  ;;  %v205_v44 = vadd.f32 1e-09, %v798_v38  ;;  %v243_v45 = vsub.f32 %v749_v6, %v242_v43  ;;  %s858_s26 = sld [smem:[#allocation2 + $0x1c]]  ;;  %s866_s27 = sld [smem:[#allocation2 + $0x15]] }
  0x38   : > { %v244_v46 = vmul.f32 %v240_v39, %v240_v39  ;;  %v148_v47 = vstv %s769_s28  ;;  %v814_v48 = vadd.f32 %v224_v42, %v223_v41  ;;  %v260_v49 = vstv %s772_s29  ;;  %s868_s28 = sld [smem:[#allocation2 + $0x1d]]  ;;  %s876_s29 = sld [smem:[#allocation2 + $0x16]] }
  0x39   : > { %533 = vlog2.f32 %v184_v37  ;;  %v263_v50 = vstv %s774_s30  ;;  %v245_v51 = vmul.f32 %v243_v45, %v243_v45  ;;  %v261_v52 = vsub.f32 %v747_v5, %v260_v49  ;;  %s878_s30 = sld [smem:[#allocation2 + $0x1e]] }
  0x3a   : > { %535 = vlog2.f32 %v205_v44  ;;  %v264_v53 = vsub.f32 %v749_v6, %v263_v50  ;;  %v147_v54 = vmul.f32 %v146_v40, %v747_v5  ;;  %v151_v55 = vstv %s782_s2  ;;  %s118_s2 = sand.u32 1, %s626_s7  }
  0x3b   : > { %v226_v56 = vadd.f32 1e-09, %v814_v48  ;;  %v281_v57 = vstv %s786_s3  ;;  %v828_v58 = vadd.f32 %v245_v51, %v244_v46  ;;  %v265_v59 = vmul.f32 %v261_v52, %v261_v52  ;;  %s455_s3 = sld [smem:[#allocation2 + $0x17]] }
  0x3c   : > { %v266_v60 = vmul.f32 %v264_v53, %v264_v53  ;;  %v282_v61 = vsub.f32 %v747_v5, %v281_v57  ;;  %v139_v62 = vadd.f32 %v138_v26, %v137_v25  ;;  %v142_v63 = vmul.f32 %v141_v33, %v749_v6 }
  0x3d   : > { %537 = vlog2.f32 %v226_v56  ;;  %v284_v0 = vstv %s795_s4  ;;  %v247_v1 = vadd.f32 1e-09, %v828_v58  ;;  %v149_v7 = vadd.f32 %v148_v47, %v147_v54  ;;  %s456_s4 = sld [smem:[#allocation2 + $0x1f]] }
  0x3e   : > { %v838_v2 = vadd.f32 %v266_v60, %v265_v59  ;;  %v285_v3 = vsub.f32 %v749_v6, %v284_v0  ;;  %v286_v4 = vmul.f32 %v282_v61, %v282_v61  ;;  %v152_v8 = vmul.f32 %v151_v55, %v749_v6 }
  0x3f   : > { %v302_v9 = vstv %s803_s5  ;;  %v305_v10 = vstv %s805_s12  ;;  %539 = vlog2.f32 %v247_v1  ;;  %v168_v16 = vstv %s810_s13  ;;  %s418_s5 = sshll.u32 %s118_s2, 4  ;;  %s459_s12 = sshll.u32 %s634_s9, 7 }
  0x40   : > { %v268_v12 = vadd.f32 1e-09, %v838_v2  ;;  %v287_v13 = vmul.f32 %v285_v3, %v285_v3  ;;  %v303_v14 = vsub.f32 %v747_v5, %v302_v9  ;;  %v172_v17 = vstv %s812_s15  ;;  %s120_s13 = scalar_lea.vmem [#allocation5], %s418_s5  ;;  %s900_s9 = scalar_lea.sflag [#allocation3], %s118_s2 }
  0x41   : > { %v532_v11 = vpop.eup %531  ;;  %v306_v18 = vsub.f32 %v749_v6, %v305_v10  ;;  %v143_v20 = vadd.f32 %v142_v63, %v139_v62  ;;  %v153_v5 = vadd.f32 %v152_v8, %v149_v7  ;;  %v189_v28 = vstv %s824_s17  ;;  %s340_s15 = sshll.u32 %s120_s13, 4  ;;  %s896_s15 = int_to_ptr.vmem [resolvable:$true] %s340_s15 }
  0x42   : > { %v165_v15 = vmul.f32 0.6931472, %v532_v11  ;;  %541 = vlog2.f32 %v268_v12  ;;  %v853_v22 = vadd.f32 %v287_v13, %v286_v4  ;;  %v307_v23 = vmul.f32 %v303_v14, %v303_v14 }
  0x43   : > { %v534_v19 = vpop.eup %533  ;;  %v308_v26 = vmul.f32 %v306_v18, %v306_v18  ;;  %v193_v6 = vstv %s826_s20  ;;  %v210_v35 = vstv %s833_s21  ;;  %v214_v36 = vstv %s835_s22  ;;  %s894_s21 = scalar_lea.hbm %s947_s1, %s459_s12  ;;  %s560_s22 = scalar_lea.vmem %s896_s15, 256 }
  0x44   : > { %v166_v24 = vmul.f32 %v165_v15, %v776_v21  ;;  %v186_v25 = vmul.f32 0.6931472, %v534_v19  ;;  %v536_v27 = vpop.eup %535  ;;  %v289_v29 = vadd.f32 1e-09, %v853_v22  ;;  %v231_v47 = vstv %s848_s23  ;;  %p561_p7 = scmp.ne.s32.totalorder %s896_s15, %s560_s22  ;;  %s645_s23 = smov [#allocation5]  }
  0x45   : > { %v207_v34 = vmul.f32 0.6931472, %v536_v27  ;;  %v309_v21 = vadd.f32 %v308_v26, %v307_v23  ;;  %v235_v49 = vstv %s850_s24  ;;  %v252_v55 = vstv %s856_s25  ;;  %s564_s24 = sshll.u32 %s645_s23, 4  ;;  %s565_s24 = int_to_ptr.vmem [resolvable:$false] %s564_s24 }
  0x46   : > { %v169_v31 = vmul.f32 %v168_v16, %v166_v24  ;;  %v173_v32 = vmul.f32 %v172_v17, %v166_v24  ;;  %v187_v33 = vmul.f32 %v186_v25, %v789_v30  ;;  %543 = vlog2.f32 %v289_v29  ;;  %p562_p9 = pnand %p561_p7, %p699_p4  ;;  %s566_s25 = scalar_lea.vmem %s565_s24, 512 }
  0x47   : > { %v538_v37 = vpop.eup %537  ;;  %v208_v30 = vmul.f32 %v207_v34, %v798_v38  ;;  %v310_v44 = vadd.f32 1e-09, %v309_v21  ;;  %v256_v56 = vstv %s858_s26  ;;  %v273_v1 = vstv %s866_s27  ;;  %p567_p11 = scmp.lt.s32.totalorder %s896_s15, %s565_s24  ;;  %p568_p12 = scmp.lt.s32.totalorder %s566_s25, %s560_s22 }
  0x48   : > { %v170_v39 = vadd.f32 %v169_v31, %v143_v20  ;;  %v174_v40 = vadd.f32 %v173_v32, %v153_v5  ;;  %v190_v41 = vmul.f32 %v189_v28, %v187_v33  ;;  %v194_v42 = vmul.f32 %v193_v6, %v187_v33  ;;  %p563_p10 = pneg %p562_p9 }
  0x49   : > { %v228_v43 = vmul.f32 0.6931472, %v538_v37  ;;  %v540_v50 = vpop.eup %539  ;;  %v211_v51 = vmul.f32 %v210_v35, %v208_v30  ;;  %v215_v52 = vmul.f32 %v214_v36, %v208_v30  ;;  %545 = vlog2.f32 %v310_v44  ;;  %p569_p13 = por %p568_p12, %p567_p11 }
  0x4a   : > { %v191_v45 = vadd.f32 %v190_v41, %v170_v39  ;;  %v195_v46 = vadd.f32 %v194_v42, %v174_v40  ;;  %v249_v54 = vmul.f32 0.6931472, %v540_v50  ;;  %v277_v3 = vstv %s868_s28 }
  0x4b   : > { %v229_v53 = vmul.f32 %v228_v43, %v814_v48  ;;  %v294_v14 = vstv %s876_s29  ;;  %v298_v15 = vstv %s878_s30  ;;  %v319_v24 = vstv %s456_s4  ;;  %p570_p0 = pnand %p569_p13, %p563_p10 }
  0x4c   : > { %v542_v38 = vpop.eup %541  ;;  %v212_v57 = vadd.f32 %v211_v51, %v191_v45  ;;  %v216_v59 = vadd.f32 %v215_v52, %v195_v46  ;;  %v250_v62 = vmul.f32 %v249_v54, %v828_v58 }
  0x4d   : > { %v232_v60 = vmul.f32 %v231_v47, %v229_v53  ;;  %v236_v61 = vmul.f32 %v235_v49, %v229_v53  ;;  %v270_v48 = vmul.f32 0.6931472, %v542_v38 }
  0x4e   : > { %v253_v4 = vmul.f32 %v252_v55, %v250_v62  ;;  %v257_v7 = vmul.f32 %v256_v56, %v250_v62 }
  0x4f   : > { %v233_v63 = vadd.f32 %v232_v60, %v212_v57  ;;  %v237_v0 = vadd.f32 %v236_v61, %v216_v59  ;;  %v271_v8 = vmul.f32 %v270_v48, %v838_v2  ;;  %v315_v2 = vstv %s455_s3 }
  0x50   : > { %v544_v9 = vpop.eup %543 }
  0x51   : > { %v254_v10 = vadd.f32 %v253_v4, %v233_v63  ;;  %v258_v11 = vadd.f32 %v257_v7, %v237_v0  ;;  %v274_v58 = vmul.f32 %v273_v1, %v271_v8  ;;  %v278_v12 = vmul.f32 %v277_v3, %v271_v8 }
  0x52   : > { %v291_v13 = vmul.f32 0.6931472, %v544_v9 }
  0x53   : > { %v546_v16 = vpop.eup %545  ;;  %v275_v17 = vadd.f32 %v274_v58, %v254_v10  ;;  %v279_v18 = vadd.f32 %v278_v12, %v258_v11 }
  0x54   : > { %v292_v19 = vmul.f32 %v291_v13, %v853_v22  ;;  %v312_v20 = vmul.f32 0.6931472, %v546_v16 }
  0x56   : > { %v295_v23 = vmul.f32 %v294_v14, %v292_v19  ;;  %v299_v5 = vmul.f32 %v298_v15, %v292_v19  ;;  %v313_v25 = vmul.f32 %v312_v20, %v309_v21 }
  0x58   : > { %v296_v26 = vadd.f32 %v295_v23, %v275_v17  ;;  %v300_v27 = vadd.f32 %v299_v5, %v279_v18  ;;  %v316_v28 = vmul.f32 %v315_v2, %v313_v25  ;;  %v320_v6 = vmul.f32 %v319_v24, %v313_v25 }
  0x5a   : > { %v317_v22 = vadd.f32 %v316_v28, %v296_v26  ;;  %v321_v29 = vadd.f32 %v320_v6, %v300_v27 }
  0x5c   : > { %322 = vst [vmem:[%s120_s13] sm:$0xff] %v317_v22  ;;  %457 = vst [vmem:[%s120_s13 + $0x8] sm:$0xff] %v321_v29 }
  0x5d   : > { %573 = shalt.err (!%p570_p0)
}
  0x5e   : > { %s574_s26 = scalar_lea.hbm %s894_s21, 256  ;;  %s578_s29 = scalar_lea.hbm %s947_s1, 512 }
  0x5f   : > { %p575_p1 = scmp.ne.s32.totalorder %s894_s21, %s574_s26  ;;  %p579_p5 = scmp.lt.u32.totalorder %s894_s21, %s947_s1 }
  0x60   : > { %p580_p6 = scmp.lt.u32.totalorder %s578_s29, %s574_s26  ;;  %p582_p9 = scmp.lt.u32.totalorder %s574_s26, %s894_s21 }
  0x61   : > { %p576_p2 = pnand %p575_p1, %p699_p4 }
  0x62   : > { %p581_p7 = por %p580_p6, %p579_p5 }
  0x63   : > { %p577_p3 = pneg %p576_p2 }
  0x64   : > { %p583_p10 = por %p582_p9, %p581_p7 }
  0x66   : > { %p584_p11 = pnand %p583_p10, %p577_p3 }
  0x68   : > { %587 = shalt.err (!%p584_p11)
}
  0x69   : > { %s646_s3 = smov 128   ;;  %s647_s4 = smov 256  }
  0x6a   : > { %s648_s5 = smov 8  }
  0x6b   : > { %466 = dma.vmem_to_hbm [thread:$0]  (%p699_p4), %s896_s15, 256, %s894_s21, %s900_s9, %s646_s3, %s647_s4, %s648_s5  }
  0x6c PF: > { %p478_p12 = scmp.ge.s32.totalorder %s642_s11, 2  ;;  %s355_s12 = sand.u32 1, %s622_s6  }
  0x6d   : > { %s356_s13 = scalar_lea.sflag [#allocation3], %s355_s12 }
  0x6e   : > { %p473_p13 = pnand %p478_p12, %p706_p8 }
  0x70   : > { %617 = dma.done.wait (!%p473_p13), %s356_s13, 256  }
  0x71   : > { %619 = vsyncadd (!%p473_p13), %s356_s13, 4294967040  ;;  %s15_s11 = sadd.s32 1, %s642_s11   ;;  %s952_s6 = smov %s626_s7 }
  0x72   : > { %p12_p0 = scmp.ge.s32.totalorder %s15_s11, 4   ;;  %s953_s7 = smov %s630_s8 }
  0x73   : > { %s954_s8 = smov %s712_s19  ;;  %s955_s9 = smov %s638_s10 }
  0x74   : > { %s956_s10 = smov %s958_s14  ;;  %14 = sbr.rel (!%p12_p0) target bundleno = 5 (0x5), region = 62 }
  0x7b   :  { %361 = vsyncpa [#allocation3], 1 }
  0x7c   :  { %363 = vsyncpa [#allocation3 + $0x1], 1 }
  0x7d   :  { %364 = vsyncpa [#allocation4], 1 }
  0x7e   :  { %366 = vsyncpa [#allocation4 + $0x1], 1 }

</bundles_post_ra>
